<compile_context>
chip_gen: v7x
topology: tpu7x:2x2x1
jax: 0.10.0
libtpu: 0.0.40
codegen_flags: <defaults>
</compile_context>

<pallas_src>
import numpy as np
import jax
import jax.numpy as jnp
from jax.experimental import pallas as pl
from jax.experimental.pallas import tpu as pltpu


def _pose_pack_kernel(kp_ref, ks_ref, out_ref):
    """kp_ref: (C, L, V), ks_ref: (L, V)  ->  out_ref: (C+1, V, L).

    L = clips_per_block * M * T is the lane axis (multiple of 128 in the batched
    case).  One whole-block 2-D load + XLU transpose + full-width store per
    channel; the keypoint_score becomes the last channel ('n t v *' pack).
    """
    C = kp_ref.shape[0]
    for c in range(C):                      # C is tiny & static -> unrolled
        out_ref[c, :, :] = kp_ref[c, :, :].T
    out_ref[C, :, :] = ks_ref[...].T


def _choose_block_clips(n_clips, lanes_per_clip, target_lanes=512):
    """Clips per grid step.

    Prefers the largest divisor of n_clips whose block lane width (bn * M*T) is
    a 128-multiple and <= target_lanes (lane-dense stores, ~512-lane tiles are
    already at ~85% of HBM roofline).  Falls back to a single full-array block,
    which is always layout-legal (block == full array dims)."""
    if n_clips * lanes_per_clip <= max(target_lanes, 128):
        return n_clips
    best = None
    for bn in range(1, n_clips + 1):
        lanes = bn * lanes_per_clip
        if n_clips % bn == 0 and lanes % 128 == 0 and lanes <= target_lanes:
            best = bn
    return best if best is not None else n_clips


def pose_pack_cvmt(keypoint, keypoint_score, *, target_lanes=512):
    """Batched pack + permute.

    keypoint:       (N, M, T, V, C)
    keypoint_score: (N, M, T, V)
    Returns a (C+1, V, N, M, T) slab; data[:, :, n] is exactly the module's
    'c v m t' output for clip n (the lane split '(n m t) -> n, m, t' is a free
    metadata-only reshape).
    """
    kp = jnp.asarray(keypoint)
    ks = jnp.asarray(keypoint_score).astype(kp.dtype)
    N, M, T, V, C = kp.shape
    L = M * T

    # Wrapper-side permute: channels off the lane axis (review item).  The
    # following reshape is a contiguous collapse -> metadata-only.
    kp_cl = jnp.moveaxis(kp, -1, 0).reshape(C, N * L, V)   # (C, N*M*T, V)
    ks_l = ks.reshape(N * L, V)                            # (N*M*T, V)

    bn = _choose_block_clips(N, L, target_lanes)
    bl = bn * L                                            # block lane width
    grid = (N // bn,)

    out_flat = pl.pallas_call(
        _pose_pack_kernel,
        out_shape=jax.ShapeDtypeStruct((C + 1, V, N * L), kp.dtype),
        grid=grid,
        in_specs=[
            pl.BlockSpec((C, bl, V), lambda i: (0, i, 0)),
            pl.BlockSpec((bl, V), lambda i: (i, 0)),
        ],
        out_specs=pl.BlockSpec((C + 1, V, bl), lambda i: (0, 0, i)),
        compiler_params=pltpu.CompilerParams(
            # Clip blocks are independent -> shard across v7x's 2 TensorCores.
            dimension_semantics=("parallel",),
        ),
    )(kp_cl, ks_l)

    # Free reshape: split lanes '(n m t) -> n, m, t'  => 'c v n m t'.
    return out_flat.reshape(C + 1, V, N, M, T)


def pose_gcn_input(x):
    """Pallas-backed equivalent of PoseGCNInput.forward (patten='c v m t')."""
    kp = jnp.asarray(x['keypoint'])                        # (M, T, V, C)
    ks = jnp.asarray(x['keypoint_score'])                  # (M, T, V)
    data = pose_pack_cvmt(kp[None], ks[None])[:, :, 0]     # (C+1, V, M, T)
    # Label handling stays host-side NumPy glue, matching the torch module.
    label = np.array(x['label'])
    return [data, label]


if __name__ == "__main__":
    key = jax.random.PRNGKey(0)
    k_kp, k_ks, k_bkp, k_bks = jax.random.split(key, 4)

    M, T, V, C = 2, 8, 16, 2        # persons, frames, joints, coords
    N = 128                         # clip batch for the lane-dense path

    # ---- single-clip path (module-equivalent semantics) ----
    keypoint = jax.random.normal(k_kp, (M, T, V, C), dtype=jnp.float32)
    keypoint_score = jax.random.uniform(k_ks, (M, T, V), dtype=jnp.float32)
    x = {"keypoint": keypoint, "keypoint_score": keypoint_score, "label": 3}

    data, label = pose_gcn_input(x)
    data = jax.block_until_ready(data)

    ref = jnp.transpose(
        jnp.concatenate([keypoint, keypoint_score[..., None]], axis=-1),
        (3, 2, 0, 1),
    )
    assert data.shape == (C + 1, V, M, T)
    assert int(label) == 3
    np.testing.assert_allclose(np.asarray(data), np.asarray(ref), rtol=0, atol=0)

    # ---- batched, lane-dense path (the performance configuration) ----
    kp_b = jax.random.normal(k_bkp, (N, M, T, V, C), dtype=jnp.float32)
    ks_b = jax.random.uniform(k_bks, (N, M, T, V), dtype=jnp.float32)

    out_b = jax.block_until_ready(pose_pack_cvmt(kp_b, ks_b))

    ref_b = jnp.transpose(
        jnp.concatenate([kp_b, ks_b[..., None]], axis=-1),   # (N, M, T, V, C+1)
        (4, 3, 0, 1, 2),                                      # (C+1, V, N, M, T)
    )
    assert out_b.shape == (C + 1, V, N, M, T)
    np.testing.assert_allclose(np.asarray(out_b), np.asarray(ref_b), rtol=0, atol=0)

    print("KERNEL_OK")
</pallas_src>

<mosaic_0001>
module attributes {stable_mosaic.version = 11 : i64} {
  func.func @_pose_pack_kernel(%arg0: i32, %arg1: memref<2x16x16xf32, #tpu.memory_space<vmem>>, %arg2: memref<16x16xf32, #tpu.memory_space<vmem>>, %arg3: memref<3x16x16xf32, #tpu.memory_space<vmem>>) attributes {dimension_semantics = [#tpu.dimension_semantics<parallel>], iteration_bounds = array<i64: 1>, scalar_prefetch = 0 : i64, scratch_operands = 0 : i64, tpu.core_type = #tpu.core_type<tc>, window_params = [{transform_indices = @transform_0, window_bounds = array<i64: 2, 16, 16>}, {transform_indices = @transform_1, window_bounds = array<i64: 16, 16>}, {transform_indices = @transform_2, window_bounds = array<i64: 3, 16, 16>}]} {
    %c0 = arith.constant 0 : index
    %c0_0 = arith.constant 0 : index
    %c0_1 = arith.constant 0 : index
    %0 = vector.load %arg1[%c0, %c0_0, %c0_1] : memref<2x16x16xf32, #tpu.memory_space<vmem>>, vector<1x16x16xf32>
    %1 = vector.shape_cast %0 : vector<1x16x16xf32> to vector<16x16xf32>
    %2 = tpu.transpose %1, [1, 0] : vector<16x16xf32> -> vector<16x16xf32>
    %c0_2 = arith.constant 0 : index
    %c0_3 = arith.constant 0 : index
    %c0_4 = arith.constant 0 : index
    %3 = vector.load %arg3[%c0_2, %c0_3, %c0_4] : memref<3x16x16xf32, #tpu.memory_space<vmem>>, vector<1x16x16xf32>
    %4 = vector.shape_cast %3 : vector<1x16x16xf32> to vector<16x16xf32>
    %5 = vector.shape_cast %2 : vector<16x16xf32> to vector<1x16x16xf32>
    tpu.vector_store %arg3[%c0_2, %c0_3, %c0_4], %5 {strides = array<i32>} : memref<3x16x16xf32, #tpu.memory_space<vmem>>, vector<1x16x16xf32>,
    %c1 = arith.constant 1 : index
    %c0_5 = arith.constant 0 : index
    %c0_6 = arith.constant 0 : index
    %6 = vector.load %arg1[%c1, %c0_5, %c0_6] : memref<2x16x16xf32, #tpu.memory_space<vmem>>, vector<1x16x16xf32>
    %7 = vector.shape_cast %6 : vector<1x16x16xf32> to vector<16x16xf32>
    %8 = tpu.transpose %7, [1, 0] : vector<16x16xf32> -> vector<16x16xf32>
    %c1_7 = arith.constant 1 : index
    %c0_8 = arith.constant 0 : index
    %c0_9 = arith.constant 0 : index
    %9 = vector.load %arg3[%c1_7, %c0_8, %c0_9] : memref<3x16x16xf32, #tpu.memory_space<vmem>>, vector<1x16x16xf32>
    %10 = vector.shape_cast %9 : vector<1x16x16xf32> to vector<16x16xf32>
    %11 = vector.shape_cast %8 : vector<16x16xf32> to vector<1x16x16xf32>
    tpu.vector_store %arg3[%c1_7, %c0_8, %c0_9], %11 {strides = array<i32>} : memref<3x16x16xf32, #tpu.memory_space<vmem>>, vector<1x16x16xf32>,
    %c0_10 = arith.constant 0 : index
    %c0_11 = arith.constant 0 : index
    %12 = vector.load %arg2[%c0_10, %c0_11] : memref<16x16xf32, #tpu.memory_space<vmem>>, vector<16x16xf32>
    %13 = tpu.transpose %12, [1, 0] : vector<16x16xf32> -> vector<16x16xf32>
    %c2 = arith.constant 2 : index
    %c0_12 = arith.constant 0 : index
    %c0_13 = arith.constant 0 : index
    %14 = vector.load %arg3[%c2, %c0_12, %c0_13] : memref<3x16x16xf32, #tpu.memory_space<vmem>>, vector<1x16x16xf32>
    %15 = vector.shape_cast %14 : vector<1x16x16xf32> to vector<16x16xf32>
    %16 = vector.shape_cast %13 : vector<16x16xf32> to vector<1x16x16xf32>
    tpu.vector_store %arg3[%c2, %c0_12, %c0_13], %16 {strides = array<i32>} : memref<3x16x16xf32, #tpu.memory_space<vmem>>, vector<1x16x16xf32>,
    return
  }
  func.func @transform_0(%arg0: i32) -> (i32, i32, i32) {
    %c0_i32 = arith.constant 0 : i32
    %c0_i32_0 = arith.constant 0 : i32
    %c0_i32_1 = arith.constant 0 : i32
    return %c0_i32, %arg0, %c0_i32_0 : i32, i32, i32
  }
  func.func @transform_1(%arg0: i32) -> (i32, i32) {
    %c0_i32 = arith.constant 0 : i32
    %c0_i32_0 = arith.constant 0 : i32
    return %arg0, %c0_i32 : i32, i32
  }
  func.func @transform_2(%arg0: i32) -> (i32, i32, i32) {
    %c0_i32 = arith.constant 0 : i32
    %c0_i32_0 = arith.constant 0 : i32
    %c0_i32_1 = arith.constant 0 : i32
    return %c0_i32, %c0_i32_0, %arg0 : i32, i32, i32
  }
}

</mosaic_0001>

<bundles_post_ra>
// kernel: tpu_custom_call.1
= control target key start
LH: loop header
LB: loop body
LE: loop exit
PB: predicated region body
PF: predicated region fallthrough
CT: control target
= control target key end

     0   :  { %7 = vsyncpa [#allocation3], 0  ;;  %s313_s0 = inlined_call_operand.hbm [shape: f32[2,16,16], index: 0, kind: input, shape index: {}]   ;;  %s314_s1 = inlined_call_operand.hbm [shape: f32[16,16], index: 1, kind: input, shape index: {}]   ;;  %s315_s2 = inlined_call_operand.hbm [shape: f32[3,16,16], index: 2, kind: output, shape index: {}]  }
   0x1   :  { %8 = vsyncpa [#allocation6], 0 }
   0x2   :  { %9 = vsyncpa [#allocation4], 0  ;;  %s248_s9 = smov [#allocation2]   ;;  %s176_s13 = scalar_lea.hbm %s313_s0, 512 }
   0x3   :  { %s15_s10 = sshll.u32 %s248_s9, 4  ;;  %p177_p0 = scmp.ne.s32.totalorder %s313_s0, %s176_s13  ;;  %s16_s10 = int_to_ptr.vmem [resolvable:$true] %s15_s10 }
   0x4   :  { %p180_p1 = scmp.lt.u32.totalorder %s176_s13, %s313_s0 }
   0x6   :  { %p182_p2 = pnand %p180_p1, %p177_p0 }
   0x8   :  { %185 = shalt.err (!%p182_p2)
}
   0x9   :  { %s186_s18 = scalar_lea.vmem %s16_s10, 512  ;;  %p191_p4 = scmp.lt.s32.totalorder %s16_s10, %s16_s10 }
   0xa   :  { %p187_p3 = scmp.ne.s32.totalorder %s16_s10, %s186_s18  ;;  %p192_p5 = scmp.lt.s32.totalorder %s186_s18, %s186_s18 }
   0xc   :  { %p193_p6 = por %p192_p5, %p191_p4 }
   0xe   :  { %p194_p7 = pnand %p193_p6, %p187_p3 }
  0x10   :  { %197 = shalt.err (!%p194_p7)
}
  0x11   :  { %s249_s19 = smov 128   ;;  %s250_s20 = smov 8  }
  0x12   :  { %21 = dma.hbm_to_vmem [thread:$0]  %s313_s0, 512, %s16_s10, [#allocation3], %s249_s19, %s249_s19, %s250_s20  }
  0x13   :  { %s251_s23 = smov [#allocation5]   ;;  %s198_s27 = scalar_lea.hbm %s314_s1, 256 }
  0x14   :  { %s27_s24 = sshll.u32 %s251_s23, 4  ;;  %p199_p8 = scmp.ne.s32.totalorder %s314_s1, %s198_s27  ;;  %s28_s24 = int_to_ptr.vmem [resolvable:$true] %s27_s24 }
  0x15   :  { %p202_p9 = scmp.lt.u32.totalorder %s198_s27, %s314_s1 }
  0x17   :  { %p204_p10 = pnand %p202_p9, %p199_p8 }
  0x19   :  { %207 = shalt.err (!%p204_p10)
}
  0x1a   :  { %s208_s4 = scalar_lea.vmem %s28_s24, 256  ;;  %p213_p12 = scmp.lt.s32.totalorder %s28_s24, %s28_s24 }
  0x1b   :  { %p209_p11 = scmp.ne.s32.totalorder %s28_s24, %s208_s4  ;;  %p214_p13 = scmp.lt.s32.totalorder %s208_s4, %s208_s4 }
  0x1d   :  { %p215_p0 = por %p214_p13, %p213_p12 }
  0x1f   :  { %p216_p1 = pnand %p215_p0, %p209_p11 }
  0x21   :  { %219 = shalt.err (!%p216_p1)
}
  0x22   :  { %33 = dma.hbm_to_vmem [thread:$0]  %s314_s1, 256, %s28_s24, [#allocation6], %s249_s19, %s249_s19, %s250_s20  }
  0x23   :  { %242 = dma.done.wait [#allocation3], 512  }
  0x24   :  { %243 = vsyncadd [#allocation3], 4294966784 }
  0x25   :  { %244 = dma.done.wait [#allocation6], 256  }
  0x26   :  { %245 = vsyncadd [#allocation6], 4294967040  ;;  %v40_v0 = vld [vmem:[#allocation2] sm:$0xff]  ;;  %v78_v1 = vld [vmem:[#allocation2 + $0x10] sm:$0xff]  ;;  %vm74_vm0 = vcmask 130048   ;;  %s252_s1 = smov [#allocation7]  }
  0x27   :  { %42 = vxpose.xlu0.b32.start [1/2] (short) (narrow) %v40_v0, 16  ;;  %80 = vxpose.xlu1.b32.start [1/2] (short) (narrow) %v78_v1, 16  ;;  %v41_v2 = vld [vmem:[#allocation2 + $0x8] sm:$0xff]  ;;  %v79_v3 = vld [vmem:[#allocation2 + $0x18] sm:$0xff]  ;;  %v115_v4 = vld [vmem:[#allocation5] sm:$0xff]  ;;  %s157_s6 = sshll.u32 %s252_s1, 4  ;;  %s158_s6 = int_to_ptr.vmem [resolvable:$true] %s157_s6 }
  0x28   :  { %v116_v5 = vld [vmem:[#allocation5 + $0x8] sm:$0xff]  ;;  %s220_s7 = scalar_lea.vmem %s158_s6, 768  ;;  %p225_p3 = scmp.lt.s32.totalorder %s158_s6, %s158_s6 }
  0x29   :  { %p221_p2 = scmp.ne.s32.totalorder %s158_s6, %s220_s7  ;;  %p226_p4 = scmp.lt.s32.totalorder %s220_s7, %s220_s7 }
  0x2b   :  { %43 = vxpose.xlu0.b32.end [2/2] (short) (narrow) %v41_v2, 16  ;;  %81 = vxpose.xlu1.b32.end [2/2] (short) (narrow) %v79_v3, 16  ;;  %p227_p5 = por %p226_p4, %p225_p3 }
  0x2d   :  { %p228_p6 = pnand %p227_p5, %p221_p2 }
  0x2f   :  { %117 = vxpose.xlu0.b32.start [1/2] (short) (narrow) %v115_v4, 16 }
  0x33   :  { %118 = vxpose.xlu0.b32.end [2/2] (short) (narrow) %v116_v5, 16 }
  0xa7   :  { %v58_v6 = vpop.trf.xlu0  ;;  %v96_v7 = vpop.trf.xlu1 }
  0xa8   :  { %75 = vst.msk [vmem:[#allocation7] sm:$0xff] %vm74_vm0, %v58_v6  ;;  %113 = vst.msk [vmem:[#allocation7 + $0x10] sm:$0xff] %vm74_vm0, %v96_v7 }
  0xab   :  { %v59_v8 = vpop.trf.xlu0  ;;  %v97_v9 = vpop.trf.xlu1 }
  0xac   :  { %76 = vst.msk [vmem:[#allocation7 + $0x8] sm:$0xff] %vm74_vm0, %v59_v8  ;;  %114 = vst.msk [vmem:[#allocation7 + $0x18] sm:$0xff] %vm74_vm0, %v97_v9 }
  0xaf   :  { %v133_v10 = vpop.trf.xlu0 }
  0xb0   :  { %150 = vst.msk [vmem:[#allocation7 + $0x20] sm:$0xff] %vm74_vm0, %v133_v10 }
  0xb3   :  { %v134_v11 = vpop.trf.xlu0 }
  0xb4   :  { %151 = vst.msk [vmem:[#allocation7 + $0x28] sm:$0xff] %vm74_vm0, %v134_v11 }
  0xb5   :  { %231 = shalt.err (!%p228_p6)
}
  0xb6   :  { %s232_s10 = scalar_lea.hbm %s315_s2, 768 }
  0xb7   :  { %p233_p7 = scmp.ne.s32.totalorder %s315_s2, %s232_s10  ;;  %p236_p8 = scmp.lt.u32.totalorder %s232_s10, %s315_s2 }
  0xb9   :  { %p238_p9 = pnand %p236_p8, %p233_p7 }
  0xbb   :  { %241 = shalt.err (!%p238_p9)
}
  0xbc   :  { %163 = dma.vmem_to_hbm [thread:$0]  %s158_s6, 768, %s315_s2, [#allocation4], %s249_s19, %s249_s19, %s250_s20  }
  0xbd   :  { %246 = dma.done.wait [#allocation4], 768  }
  0xbe   :  { %247 = vsyncadd [#allocation4], 4294966528 }
  0xbf   :  { %167 = vsyncpa [#allocation3], 1 }
  0xc0   :  { %168 = vsyncpa [#allocation6], 1 }
  0xc1   :  { %169 = vsyncpa [#allocation4], 1 }

</bundles_post_ra>
